<compile_context>
chip_gen: v6e
topology: v6e:2x2x1
jax: 0.10.0
libtpu: 0.0.40
codegen_flags: <defaults>
</compile_context>

<pallas_src>
import functools

import jax
import jax.numpy as jnp
from jax.experimental import pallas as pl
from jax.experimental.pallas import tpu as pltpu


def _kd_kl_div_kernel(pred_ref, soft_ref, out_ref, *, inv_T, scale):
    """Per-row KD loss: mean_c[target * (log target - log_softmax(pred/T))] * T^2.

    pred_ref, soft_ref : (TN, C) logit tiles
    out_ref            : (TN, 1) per-sample loss
    inv_T              : 1 / T
    scale              : T*T / C  (fused 'mean over classes' + temperature^2)
    """
    pred = pred_ref[...].astype(jnp.float32) * inv_T
    soft = soft_ref[...].astype(jnp.float32) * inv_T

    # target = softmax(soft_label / T); log(target) via shifted logits (stable).
    s_shift = soft - jnp.max(soft, axis=-1, keepdims=True)
    s_exp = jnp.exp(s_shift)
    s_sum = jnp.sum(s_exp, axis=-1, keepdims=True)
    target = s_exp * pl.reciprocal(s_sum, approx=True)  # EUP slot, ~free
    log_target = s_shift - jnp.log(s_sum)

    # log_softmax(pred / T)
    p_shift = pred - jnp.max(pred, axis=-1, keepdims=True)
    p_sum = jnp.sum(jnp.exp(p_shift), axis=-1, keepdims=True)
    log_p = p_shift - jnp.log(p_sum)

    # F.kl_div(log_p, target, reduction='none') == target * (log(target) - log_p)
    kd = target * (log_target - log_p)

    out_ref[...] = (jnp.sum(kd, axis=-1, keepdims=True) * scale).astype(out_ref.dtype)


def knowledge_distillation_kl_div_loss(pred, soft_label, T):
    """Pallas-backed per-sample KD KL-div loss. Returns shape (N,) float32."""
    assert pred.ndim == 2 and pred.shape == soft_label.shape
    N, C = pred.shape

    # --- row-tile size: biggest multiple of 8 under a conservative VMEM budget -
    itemsize = jnp.dtype(pred.dtype).itemsize
    input_budget = 16 * 1024 * 1024          # for 2 inputs x 2 pipeline buffers
    tn = input_budget // (2 * 2 * max(C, 128) * itemsize)
    tn = max(8, (tn // 8) * 8)
    tn = min(tn, 2048)                       # keep >1 grid step for big N (megacore)
    if N <= tn:
        tn = N                               # full-extent block is always legal

    grid = (pl.cdiv(N, tn),)
    kernel = functools.partial(
        _kd_kl_div_kernel, inv_T=1.0 / float(T), scale=float(T) * float(T) / float(C)
    )

    out = pl.pallas_call(
        kernel,
        out_shape=jax.ShapeDtypeStruct((N, 1), jnp.float32),
        grid=grid,
        in_specs=[
            pl.BlockSpec((tn, C), lambda i: (i, 0)),   # full-extent class axis
            pl.BlockSpec((tn, C), lambda i: (i, 0)),
        ],
        out_specs=pl.BlockSpec((tn, 1), lambda i: (i, 0)),
        compiler_params=pltpu.CompilerParams(
            dimension_semantics=("parallel",),      # rows independent (v7x 2 TCs)
            vmem_limit_bytes=32 * 1024 * 1024,      # explicit (v5e default is lower)
        ),
    )(pred, soft_label)
    return out[:, 0]


def _weight_reduce_loss(loss, weight=None, reduction="mean", avg_factor=None):
    """mmdet weight_reduce_loss semantics (runs on a tiny (N,) vector)."""
    if weight is not None:
        loss = loss * weight
    if avg_factor is None:
        if reduction == "mean":
            return jnp.mean(loss)
        if reduction == "sum":
            return jnp.sum(loss)
        if reduction == "none":
            return loss
        raise ValueError(reduction)
    if reduction == "mean":
        return jnp.sum(loss) / avg_factor
    if reduction == "none":
        return loss
    raise ValueError("avg_factor can not be used with reduction='sum'")


class KnowledgeDistillationKLDivLoss:
    """JAX/Pallas port of mmdet KnowledgeDistillationKLDivLoss (no parameters)."""

    def __init__(self, reduction="mean", loss_weight=1.0, T=10):
        assert T >= 1
        self.reduction = reduction
        self.loss_weight = loss_weight
        self.T = T

    def __call__(self, pred, soft_label, weight=None, avg_factor=None,
                 reduction_override=None):
        assert reduction_override in (None, "none", "mean", "sum")
        reduction = reduction_override if reduction_override else self.reduction
        # detach_target=True: forward no-op; stop_gradient kept for fidelity.
        soft_label = jax.lax.stop_gradient(soft_label)
        loss = knowledge_distillation_kl_div_loss(pred, soft_label, self.T)
        loss = _weight_reduce_loss(loss, weight=weight, reduction=reduction,
                                   avg_factor=avg_factor)
        return self.loss_weight * loss


if __name__ == "__main__":
    key = jax.random.PRNGKey(0)
    k1, k2, k3 = jax.random.split(key, 3)

    N, C = 8, 16  # (N, n + 1) logits
    T = 10
    pred = jax.random.normal(k1, (N, C), dtype=jnp.float32)
    soft_label = jax.random.normal(k2, (N, C), dtype=jnp.float32)
    weight = jax.random.uniform(k3, (N,), dtype=jnp.float32)

    loss_fn = KnowledgeDistillationKLDivLoss(reduction="mean", loss_weight=1.0, T=T)

    out_mean = loss_fn(pred, soft_label)
    jax.block_until_ready(out_mean)

    out_none = loss_fn(pred, soft_label, reduction_override="none")
    jax.block_until_ready(out_none)

    out_wavg = loss_fn(pred, soft_label, weight=weight, avg_factor=4.0)
    jax.block_until_ready(out_wavg)

    # pure-JAX reference check of the per-sample loss
    def ref(p, s, t):
        tgt = jax.nn.softmax(s / t, axis=1)
        logp = jax.nn.log_softmax(p / t, axis=1)
        return (tgt * (jnp.log(tgt) - logp)).mean(axis=1) * (t * t)

    ref_none = ref(pred, soft_label, float(T))
    assert out_none.shape == (N,)
    assert out_mean.shape == ()
    assert out_wavg.shape == ()
    assert bool(jnp.all(jnp.isfinite(out_none)))
    assert bool(jnp.isfinite(out_mean))
    assert bool(jnp.allclose(out_none, ref_none, rtol=1e-2, atol=1e-4))
    assert bool(jnp.allclose(out_mean, jnp.mean(ref_none), rtol=1e-2, atol=1e-4))

    print("KERNEL_OK")
</pallas_src>

<mosaic_0001>
module attributes {stable_mosaic.version = 11 : i64} {
  func.func @_kd_kl_div_kernel(%arg0: i32, %arg1: memref<8x16xf32, #tpu.memory_space<vmem>>, %arg2: memref<8x16xf32, #tpu.memory_space<vmem>>, %arg3: memref<8x1xf32, #tpu.memory_space<vmem>>) attributes {dimension_semantics = [#tpu.dimension_semantics<parallel>], iteration_bounds = array<i64: 1>, scalar_prefetch = 0 : i64, scratch_operands = 0 : i64, tpu.core_type = #tpu.core_type<tc>, window_params = [{transform_indices = @transform_0, window_bounds = array<i64: 8, 16>}, {transform_indices = @transform_1, window_bounds = array<i64: 8, 16>}, {transform_indices = @transform_2, window_bounds = array<i64: 8, 1>}]} {
    %c0 = arith.constant 0 : index
    %c0_0 = arith.constant 0 : index
    %0 = vector.load %arg1[%c0, %c0_0] : memref<8x16xf32, #tpu.memory_space<vmem>>, vector<8x16xf32>
    %cst = arith.constant 1.000000e-01 : f32
    %1 = vector.broadcast %cst : f32 to vector<8x16xf32>
    %2 = arith.mulf %0, %1 : vector<8x16xf32>
    %c0_1 = arith.constant 0 : index
    %c0_2 = arith.constant 0 : index
    %3 = vector.load %arg2[%c0_1, %c0_2] : memref<8x16xf32, #tpu.memory_space<vmem>>, vector<8x16xf32>
    %cst_3 = arith.constant 1.000000e-01 : f32
    %4 = vector.broadcast %cst_3 : f32 to vector<8x16xf32>
    %5 = arith.mulf %3, %4 : vector<8x16xf32>
    %cst_4 = arith.constant dense<0xFF800000> : vector<8xf32>
    %6 = vector.multi_reduction <maximumf>, %5, %cst_4 [1] : vector<8x16xf32> to vector<8xf32>
    %7 = vector.shape_cast %6 : vector<8xf32> to vector<8x1xf32>
    %8 = vector.broadcast %7 : vector<8x1xf32> to vector<8x16xf32>
    %9 = arith.subf %5, %8 : vector<8x16xf32>
    %10 = math.exp %9 : vector<8x16xf32>
    %cst_5 = arith.constant dense<0.000000e+00> : vector<8xf32>
    %11 = vector.multi_reduction <add>, %10, %cst_5 [1] : vector<8x16xf32> to vector<8xf32>
    %12 = vector.shape_cast %11 : vector<8xf32> to vector<8x1xf32>
    %13 = tpu.reciprocal %12 {approx = true} : vector<8x1xf32> -> vector<8x1xf32>
    %14 = vector.broadcast %13 : vector<8x1xf32> to vector<8x16xf32>
    %15 = arith.mulf %10, %14 : vector<8x16xf32>
    %16 = math.log %12 : vector<8x1xf32>
    %17 = vector.broadcast %16 : vector<8x1xf32> to vector<8x16xf32>
    %18 = arith.subf %9, %17 : vector<8x16xf32>
    %cst_6 = arith.constant dense<0xFF800000> : vector<8xf32>
    %19 = vector.multi_reduction <maximumf>, %2, %cst_6 [1] : vector<8x16xf32> to vector<8xf32>
    %20 = vector.shape_cast %19 : vector<8xf32> to vector<8x1xf32>
    %21 = vector.broadcast %20 : vector<8x1xf32> to vector<8x16xf32>
    %22 = arith.subf %2, %21 : vector<8x16xf32>
    %23 = math.exp %22 : vector<8x16xf32>
    %cst_7 = arith.constant dense<0.000000e+00> : vector<8xf32>
    %24 = vector.multi_reduction <add>, %23, %cst_7 [1] : vector<8x16xf32> to vector<8xf32>
    %25 = vector.shape_cast %24 : vector<8xf32> to vector<8x1xf32>
    %26 = math.log %25 : vector<8x1xf32>
    %27 = vector.broadcast %26 : vector<8x1xf32> to vector<8x16xf32>
    %28 = arith.subf %22, %27 : vector<8x16xf32>
    %29 = arith.subf %18, %28 : vector<8x16xf32>
    %30 = arith.mulf %15, %29 : vector<8x16xf32>
    %cst_8 = arith.constant dense<0.000000e+00> : vector<8xf32>
    %31 = vector.multi_reduction <add>, %30, %cst_8 [1] : vector<8x16xf32> to vector<8xf32>
    %32 = vector.shape_cast %31 : vector<8xf32> to vector<8x1xf32>
    %cst_9 = arith.constant 6.250000e+00 : f32
    %33 = vector.broadcast %cst_9 : f32 to vector<8x1xf32>
    %34 = arith.mulf %32, %33 : vector<8x1xf32>
    %c0_10 = arith.constant 0 : index
    %c0_11 = arith.constant 0 : index
    %35 = vector.load %arg3[%c0_10, %c0_11] : memref<8x1xf32, #tpu.memory_space<vmem>>, vector<8x1xf32>
    tpu.vector_store %arg3[%c0_10, %c0_11], %34 {strides = array<i32>} : memref<8x1xf32, #tpu.memory_space<vmem>>, vector<8x1xf32>,
    return
  }
  func.func @transform_0(%arg0: i32) -> (i32, i32) {
    %c0_i32 = arith.constant 0 : i32
    %c0_i32_0 = arith.constant 0 : i32
    return %arg0, %c0_i32 : i32, i32
  }
  func.func @transform_1(%arg0: i32) -> (i32, i32) {
    %c0_i32 = arith.constant 0 : i32
    %c0_i32_0 = arith.constant 0 : i32
    return %arg0, %c0_i32 : i32, i32
  }
  func.func @transform_2(%arg0: i32) -> (i32, i32) {
    %c0_i32 = arith.constant 0 : i32
    %c0_i32_0 = arith.constant 0 : i32
    return %arg0, %c0_i32 : i32, i32
  }
}

</mosaic_0001>

<bundles_post_ra>
// kernel: tpu_custom_call.1
= control target key start
LH: loop header
LB: loop body
LE: loop exit
PB: predicated region body
PF: predicated region fallthrough
CT: control target
= control target key end

     0   :  { %7 = vsyncpa [#allocation3], 0  ;;  %s167_s0 = inlined_call_operand.hbm [shape: f32[8,16], index: 0, kind: input, shape index: {}]   ;;  %s168_s1 = inlined_call_operand.hbm [shape: f32[8,16], index: 1, kind: input, shape index: {}]   ;;  %s169_s2 = inlined_call_operand.vmem [shape: f32[8,1], index: 2, kind: output, shape index: {}]  }
   0x1   :  { %8 = vsyncpa [#allocation5], 0  ;;  %s136_s9 = smov [#allocation2]   ;;  %s137_s11 = smov [#allocation4]  }
   0x2   :  { %s15_s10 = sshll.u32 %s136_s9, 4  ;;  %s25_s12 = sshll.u32 %s137_s11, 4  ;;  %s16_s10 = int_to_ptr.vmem [resolvable:$true] %s15_s10  ;;  %s26_s12 = int_to_ptr.vmem [resolvable:$true] %s25_s12 }
   0x3   :  { %s100_s13 = scalar_lea.vmem %s16_s10, 128  ;;  %p105_p1 = scmp.lt.s32.totalorder %s16_s10, %s16_s10 }
   0x4   :  { %p101_p0 = scmp.ne.s32.totalorder %s16_s10, %s100_s13  ;;  %p106_p2 = scmp.lt.s32.totalorder %s100_s13, %s100_s13 }
   0x6   :  { %p107_p3 = por %p106_p2, %p105_p1 }
   0x8   :  { %p108_p4 = pnand %p107_p3, %p101_p0 }
   0xa   :  { %111 = shalt.err (!%p108_p4)
}
   0xb   :  { %18 = dma.hbm_to_vmem [thread:$0]  %s167_s0, 128, %s16_s10, [#allocation3]  }
   0xc   :  { %s120_s16 = scalar_lea.vmem %s26_s12, 128  ;;  %p125_p6 = scmp.lt.s32.totalorder %s26_s12, %s26_s12 }
   0xd   :  { %p121_p5 = scmp.ne.s32.totalorder %s26_s12, %s120_s16  ;;  %p126_p7 = scmp.lt.s32.totalorder %s120_s16, %s120_s16 }
   0xf   :  { %p127_p8 = por %p126_p7, %p125_p6 }
  0x11   :  { %p128_p9 = pnand %p127_p8, %p121_p5 }
  0x13   :  { %131 = shalt.err (!%p128_p9)
}
  0x14   :  { %28 = dma.hbm_to_vmem [thread:$0]  %s168_s1, 128, %s26_s12, [#allocation5]  }
  0x15   :  { %132 = dma.done.wait [#allocation3], 128  }
  0x16   :  { %133 = vsyncadd [#allocation3], 4294967168 }
  0x17   :  { %134 = dma.done.wait [#allocation5], 128  }
  0x18   :  { %135 = vsyncadd [#allocation5], 4294967168  ;;  %v37_v0 = vld [vmem:[#allocation4] sm:$0xff]  ;;  %vm39_vm0 = vcmask 130048   ;;  %v35_v1 = vld [vmem:[#allocation2] sm:$0xff]  ;;  %vm72_vm1 = vcmask 7168  }
  0x19   :  { %v38_v2 = vmul.f32 0.1, %v37_v0  ;;  %v36_v3 = vmul.f32 0.1, %v35_v1 }
  0x1b   :  { %v40_v4 = vsel %vm39_vm0, %v38_v2, -inf  ;;  %v54_v5 = vsel %vm39_vm0, %v36_v3, -inf }
  0x1c   :  { %41 = vmax.xlane.f32.xlu0 %v40_v4 }
  0x20   :  { %55 = vmax.xlane.f32.xlu0 %v54_v5 }
  0xa5   :  { %v42_v6 = vpop.xlane.xlu0 %41 }
  0xa6   :  { %v43_v7 = vsub.f32 %v38_v2, %v42_v6 }
  0xa8   :  { %v44_v8 = vmul.f32 1.442695, %v43_v7 }
  0xa9   :  { %v56_v9 = vpop.xlane.xlu0 %55 }
  0xaa   :  { %82 = vpow2.f32 %v44_v8  ;;  %v57_v10 = vsub.f32 %v36_v3, %v56_v9 }
  0xac   :  { %v58_v11 = vmul.f32 1.442695, %v57_v10 }
  0xae   :  { %84 = vpow2.f32 %v58_v11 }
  0xb7   :  { %v83_v12 = vpop.eup %82 }
  0xb8   :  { %v46_v13 = vsel %vm39_vm0, %v83_v12, 0.0 }
  0xb9   :  { %47 = vadd.xlane.f32.xlu1 %v46_v13 }
  0xbb   :  { %v85_v14 = vpop.eup %84 }
  0xbc   :  { %v60_v15 = vsel %vm39_vm0, %v85_v14, 0.0 }
  0xbd   :  { %61 = vadd.xlane.f32.xlu1 %v60_v15 }
 0x142   :  { %v48_v16 = vpop.xlane.xlu1 %47 }
 0x143   :  { %86 = vlog2.f32 %v48_v16 }
 0x146   :  { %v62_v17 = vpop.xlane.xlu1 %61 }
 0x147   :  { %88 = vlog2.f32 %v62_v17 }
 0x148   :  { %90 = vrcp.f32 %v48_v16 }
 0x150   :  { %v87_v18 = vpop.eup %86 }
 0x151   :  { %v52_v19 = vmul.f32 0.6931472, %v87_v18 }
 0x153   :  { %v53_v24 = vsub.f32 %v43_v7, %v52_v19 }
 0x154   :  { %v89_v20 = vpop.eup %88 }
 0x155   :  { %v64_v21 = vmul.f32 0.6931472, %v89_v20  ;;  %v91_v22 = vpop.eup %90 }
 0x156   :  { %v50_v25 = vmul.f32 %v91_v22, %v83_v12 }
 0x157   :  { %v65_v23 = vsub.f32 %v57_v10, %v64_v21 }
 0x159   :  { %v66_v26 = vsub.f32 %v53_v24, %v65_v23 }
 0x15b   :  { %v67_v27 = vmul.f32 %v66_v26, %v50_v25 }
 0x15d   :  { %v68_v28 = vsel %vm39_vm0, %v67_v27, 0.0 }
 0x15e   :  { %69 = vadd.xlane.f32.xlu0 %v68_v28 }
 0x1e7   :  { %v70_v29 = vpop.xlane.xlu0 %69 }
 0x1e8   :  { %v71_v30 = vmul.f32 6.25, %v70_v29 }
 0x1ea   :  { %73 = vst.msk [vmem:[%s169_s2] sm:$0xff] %vm72_vm1, %v71_v30 }
 0x1eb   :  { %78 = vsyncpa [#allocation3], 1 }
 0x1ec   :  { %79 = vsyncpa [#allocation5], 1 }

</bundles_post_ra>
